<compile_context>
chip_gen: v7x
topology: tpu7x:2x2x1
jax: 0.10.0
libtpu: 0.0.40
codegen_flags: <defaults>
</compile_context>

<pallas_src>
import math

import jax
import jax.numpy as jnp
from jax.experimental import pallas as pl
from jax.experimental.pallas import tpu as pltpu


def critic_kernel(state_ref, action_ref, w1s_ref, w1a_ref, b1_ref,
                  w2_ref, b2_ref, w3_ref, b3_ref, q_ref):
    f32 = jnp.float32
    bf16 = jnp.bfloat16

    # fc1 + ReLU, feature-major:
    #   (H, S) @ (S, TILE_B) + (H, A) @ (A, TILE_B) + b1  ->  (H, TILE_B)
    h1 = (jnp.dot(w1s_ref[...], state_ref[...], preferred_element_type=f32)
          + jnp.dot(w1a_ref[...], action_ref[...], preferred_element_type=f32)
          + b1_ref[...])
    h1 = jnp.maximum(h1, 0.0)

    # fc2 + ReLU:  (H, H) @ (H, TILE_B) + b2  ->  (H, TILE_B)
    h2 = jnp.dot(w2_ref[...], h1.astype(bf16),
                 preferred_element_type=f32) + b2_ref[...]
    h2 = jnp.maximum(h2, 0.0)

    # fc3:  (1, H) @ (H, TILE_B)  ->  (1, TILE_B) lane-dense q row.
    q = jnp.dot(w3_ref[...], h2.astype(bf16), preferred_element_type=f32)
    q_ref[...] = q + b3_ref[0, 0]  # scalar bias from SMEM


def _round_up(x, m):
    return ((x + m - 1) // m) * m


def _select_tiling(batch, max_tile_b=8192, align=256):
    """Pick (tile_b, b_pad).

    Small batches: one full-extent tile (block == array dims -> always legal,
    no padding).  Large batches: 256-aligned tiles (v6e/v7x MXU width), >= 2
    per call so the "parallel" batch axis shards across both TensorCores on
    v7x, capped at max_tile_b to amortize the ~0.35us/grid-step overhead.
    """
    if batch <= 2 * align:
        return batch, batch
    tile_b = min(max_tile_b, _round_up(pl.cdiv(batch, 2), align))
    b_pad = _round_up(batch, tile_b)
    return tile_b, b_pad


def critic_forward(state, action, params, max_tile_b=8192):
    """DDPG Critic forward.

    state: (B, state_dim) f32, action: (B, action_dim) f32 (module layout).
    params = (w1s_fm, w1a_fm, b1, w2_fm, b2, w3_fm, b3) in feature-major /
    PyTorch (out_features, in_features) layout — see init_critic_params.
    Returns q of shape (B, 1) f32.
    """
    w1s, w1a, b1, w2, b2, w3, b3 = params
    B, state_dim = state.shape
    action_dim = action.shape[1]
    hidden_dim = w2.shape[0]

    tile_b, b_pad = _select_tiling(B, max_tile_b=max_tile_b)
    num_tiles = b_pad // tile_b

    # Layout plumbing: transpose to feature-major and cast to bf16 in one
    # fused XLA op (the kernel consumes bf16 MXU operands anyway).
    state_t = state.T.astype(jnp.bfloat16)    # (S, B)
    action_t = action.T.astype(jnp.bfloat16)  # (A, B)
    if b_pad != B:
        # Only hit when B is large and not tile-aligned; pads the *small*
        # feature-major arrays.  Padded columns produce garbage q that is
        # sliced off below.
        state_t = jnp.pad(state_t, ((0, 0), (0, b_pad - B)))
        action_t = jnp.pad(action_t, ((0, 0), (0, b_pad - B)))

    batch_map = lambda i: (0, i)
    const_map = lambda i: (0, 0)

    grid_spec = pltpu.PrefetchScalarGridSpec(
        num_scalar_prefetch=0,
        grid=(num_tiles,),
        in_specs=[
            pl.BlockSpec((state_dim, tile_b), batch_map),       # state tile (streams)
            pl.BlockSpec((action_dim, tile_b), batch_map),      # action tile (streams)
            pl.BlockSpec((hidden_dim, state_dim), const_map),   # W1[:, :S]   (resident)
            pl.BlockSpec((hidden_dim, action_dim), const_map),  # W1[:, S:]   (resident)
            pl.BlockSpec((hidden_dim, 1), const_map),           # b1 column
            pl.BlockSpec((hidden_dim, hidden_dim), const_map),  # W2          (resident)
            pl.BlockSpec((hidden_dim, 1), const_map),           # b2 column
            pl.BlockSpec((1, hidden_dim), const_map),           # W3 row      (resident)
            pl.BlockSpec(memory_space=pltpu.MemorySpace.SMEM),  # b3 scalar
        ],
        out_specs=pl.BlockSpec((1, tile_b), batch_map),         # lane-dense q row
    )

    q_row = pl.pallas_call(
        critic_kernel,
        out_shape=jax.ShapeDtypeStruct((1, b_pad), jnp.float32),
        grid_spec=grid_spec,
        compiler_params=pltpu.CompilerParams(
            # Shard batch tiles across TensorCores on v7x (no-op on v5e/v6e).
            dimension_semantics=("parallel",),
            # Headroom over v5e's 16 MiB scoped default; within v7x's budget.
            vmem_limit_bytes=32 * 1024 * 1024,
        ),
    )(state_t, action_t, w1s, w1a, b1, w2, b2, w3, b3)

    # Glue: back to the module's (B, 1) output shape.
    return q_row[0, :B].reshape(B, 1)


def init_critic_params(key, state_dim, action_dim, hidden_dim):
    """Deterministic init matching torch.nn.Linear defaults, stored in the
    kernel's feature-major layout (== PyTorch (out_features, in_features))."""
    def linear(k, fan_in, fan_out):
        kw, kb = jax.random.split(k)
        bound = 1.0 / math.sqrt(fan_in)
        w = jax.random.uniform(kw, (fan_in, fan_out), jnp.float32, -bound, bound)
        b = jax.random.uniform(kb, (fan_out,), jnp.float32, -bound, bound)
        return w, b

    k1, k2, k3 = jax.random.split(key, 3)
    w1, b1 = linear(k1, state_dim + action_dim, hidden_dim)
    w2, b2 = linear(k2, hidden_dim, hidden_dim)
    w3, b3 = linear(k3, hidden_dim, 1)

    w1s_fm = w1[:state_dim].T.astype(jnp.bfloat16)   # (H, S)
    w1a_fm = w1[state_dim:].T.astype(jnp.bfloat16)   # (H, A)
    b1_col = b1.reshape(hidden_dim, 1)               # (H, 1) f32
    w2_fm = w2.T.astype(jnp.bfloat16)                # (H, H)  (out, in)
    b2_col = b2.reshape(hidden_dim, 1)               # (H, 1) f32
    w3_fm = w3.T.astype(jnp.bfloat16)                # (1, H)  (out, in)
    b3_s = b3.reshape(1, 1)                          # (1, 1) f32 scalar for SMEM
    return (w1s_fm, w1a_fm, b1_col, w2_fm, b2_col, w3_fm, b3_s)


if __name__ == "__main__":
    batch = 8
    state_dim = 12
    action_dim = 4
    hidden_dim = 32

    key = jax.random.PRNGKey(0)
    k_state, k_action, k_params = jax.random.split(key, 3)

    state = jax.random.normal(k_state, (batch, state_dim), jnp.float32)
    action = jax.random.normal(k_action, (batch, action_dim), jnp.float32)
    params = init_critic_params(k_params, state_dim, action_dim, hidden_dim)

    q = critic_forward(state, action, params)
    q = jax.block_until_ready(q)

    # Pure-JAX reference with identical feature-major bf16-matmul /
    # f32-accumulate semantics.
    w1s, w1a, b1, w2, b2, w3, b3 = params
    s_t = state.T.astype(jnp.bfloat16)
    a_t = action.T.astype(jnp.bfloat16)
    h1 = jnp.maximum(
        jnp.dot(w1s, s_t, preferred_element_type=jnp.float32)
        + jnp.dot(w1a, a_t, preferred_element_type=jnp.float32) + b1, 0.0)
    h2 = jnp.maximum(
        jnp.dot(w2, h1.astype(jnp.bfloat16),
                preferred_element_type=jnp.float32) + b2, 0.0)
    q_ref = (jnp.dot(w3, h2.astype(jnp.bfloat16),
                     preferred_element_type=jnp.float32) + b3)[0].reshape(batch, 1)

    assert q.shape == (batch, 1), q.shape
    assert jnp.allclose(q, q_ref, atol=2e-3, rtol=2e-3), (q, q_ref)

    print("KERNEL_OK")
</pallas_src>

<mosaic_0001>
module attributes {stable_mosaic.version = 11 : i64} {
  func.func @critic_kernel(%arg0: i32, %arg1: memref<12x8xbf16, #tpu.memory_space<vmem>>, %arg2: memref<4x8xbf16, #tpu.memory_space<vmem>>, %arg3: memref<32x12xbf16, #tpu.memory_space<vmem>>, %arg4: memref<32x4xbf16, #tpu.memory_space<vmem>>, %arg5: memref<32x1xf32, #tpu.memory_space<vmem>>, %arg6: memref<32x32xbf16, #tpu.memory_space<vmem>>, %arg7: memref<32x1xf32, #tpu.memory_space<vmem>>, %arg8: memref<1x32xbf16, #tpu.memory_space<vmem>>, %arg9: memref<1x1xf32, #tpu.memory_space<smem>>, %arg10: memref<1x8xf32, #tpu.memory_space<vmem>>) attributes {dimension_semantics = [#tpu.dimension_semantics<parallel>], iteration_bounds = array<i64: 1>, scalar_prefetch = 0 : i64, scratch_operands = 0 : i64, tpu.core_type = #tpu.core_type<tc>, window_params = [{transform_indices = @transform_0, window_bounds = array<i64: 12, 8>}, {transform_indices = @transform_1, window_bounds = array<i64: 4, 8>}, {pipeline_mode = #tpu.pipeline_mode<synchronous>, transform_indices = @transform_2, window_bounds = array<i64: 32, 12>}, {pipeline_mode = #tpu.pipeline_mode<synchronous>, transform_indices = @transform_3, window_bounds = array<i64: 32, 4>}, {pipeline_mode = #tpu.pipeline_mode<synchronous>, transform_indices = @transform_4, window_bounds = array<i64: 32, 1>}, {pipeline_mode = #tpu.pipeline_mode<synchronous>, transform_indices = @transform_5, window_bounds = array<i64: 32, 32>}, {pipeline_mode = #tpu.pipeline_mode<synchronous>, transform_indices = @transform_6, window_bounds = array<i64: 32, 1>}, {pipeline_mode = #tpu.pipeline_mode<synchronous>, transform_indices = @transform_7, window_bounds = array<i64: 1, 32>}, {transform_indices = @transform_8, window_bounds = array<i64: 1, 1>}, {transform_indices = @transform_9, window_bounds = array<i64: 1, 8>}]} {
    %c0 = arith.constant 0 : index
    %c0_0 = arith.constant 0 : index
    %0 = vector.load %arg3[%c0, %c0_0] : memref<32x12xbf16, #tpu.memory_space<vmem>>, vector<32x12xbf16>
    %c0_1 = arith.constant 0 : index
    %c0_2 = arith.constant 0 : index
    %1 = vector.load %arg1[%c0_1, %c0_2] : memref<12x8xbf16, #tpu.memory_space<vmem>>, vector<12x8xbf16>
    %cst = arith.constant dense<0.000000e+00> : vector<32x8xf32>
    %2 = tpu.matmul %0, %1, %cst {dimension_numbers = #tpu.dot_dimension_numbers<[1], [0], [0], [1], [0, 0, 1, 1], [], []>} : vector<32x12xbf16>, vector<12x8xbf16>, vector<32x8xf32> -> vector<32x8xf32>
    %c0_3 = arith.constant 0 : index
    %c0_4 = arith.constant 0 : index
    %3 = vector.load %arg4[%c0_3, %c0_4] : memref<32x4xbf16, #tpu.memory_space<vmem>>, vector<32x4xbf16>
    %c0_5 = arith.constant 0 : index
    %c0_6 = arith.constant 0 : index
    %4 = vector.load %arg2[%c0_5, %c0_6] : memref<4x8xbf16, #tpu.memory_space<vmem>>, vector<4x8xbf16>
    %cst_7 = arith.constant dense<0.000000e+00> : vector<32x8xf32>
    %5 = tpu.matmul %3, %4, %cst_7 {dimension_numbers = #tpu.dot_dimension_numbers<[1], [0], [0], [1], [0, 0, 1, 1], [], []>} : vector<32x4xbf16>, vector<4x8xbf16>, vector<32x8xf32> -> vector<32x8xf32>
    %6 = arith.addf %2, %5 : vector<32x8xf32>
    %c0_8 = arith.constant 0 : index
    %c0_9 = arith.constant 0 : index
    %7 = vector.load %arg5[%c0_8, %c0_9] : memref<32x1xf32, #tpu.memory_space<vmem>>, vector<32x1xf32>
    %8 = vector.broadcast %7 : vector<32x1xf32> to vector<32x8xf32>
    %9 = arith.addf %6, %8 : vector<32x8xf32>
    %cst_10 = arith.constant 0.000000e+00 : f32
    %10 = vector.broadcast %cst_10 : f32 to vector<32x8xf32>
    %11 = arith.maximumf %9, %10 : vector<32x8xf32>
    %c0_11 = arith.constant 0 : index
    %c0_12 = arith.constant 0 : index
    %12 = vector.load %arg6[%c0_11, %c0_12] : memref<32x32xbf16, #tpu.memory_space<vmem>>, vector<32x32xbf16>
    %13 = arith.truncf %11 : vector<32x8xf32> to vector<32x8xbf16>
    %cst_13 = arith.constant dense<0.000000e+00> : vector<32x8xf32>
    %14 = tpu.matmul %12, %13, %cst_13 {dimension_numbers = #tpu.dot_dimension_numbers<[1], [0], [0], [1], [0, 0, 1, 1], [], []>} : vector<32x32xbf16>, vector<32x8xbf16>, vector<32x8xf32> -> vector<32x8xf32>
    %c0_14 = arith.constant 0 : index
    %c0_15 = arith.constant 0 : index
    %15 = vector.load %arg7[%c0_14, %c0_15] : memref<32x1xf32, #tpu.memory_space<vmem>>, vector<32x1xf32>
    %16 = vector.broadcast %15 : vector<32x1xf32> to vector<32x8xf32>
    %17 = arith.addf %14, %16 : vector<32x8xf32>
    %cst_16 = arith.constant 0.000000e+00 : f32
    %18 = vector.broadcast %cst_16 : f32 to vector<32x8xf32>
    %19 = arith.maximumf %17, %18 : vector<32x8xf32>
    %c0_17 = arith.constant 0 : index
    %c0_18 = arith.constant 0 : index
    %20 = vector.load %arg8[%c0_17, %c0_18] : memref<1x32xbf16, #tpu.memory_space<vmem>>, vector<1x32xbf16>
    %21 = arith.truncf %19 : vector<32x8xf32> to vector<32x8xbf16>
    %cst_19 = arith.constant dense<0.000000e+00> : vector<1x8xf32>
    %22 = tpu.matmul %20, %21, %cst_19 {dimension_numbers = #tpu.dot_dimension_numbers<[1], [0], [0], [1], [0, 0, 1, 1], [], []>} : vector<1x32xbf16>, vector<32x8xbf16>, vector<1x8xf32> -> vector<1x8xf32>
    %c0_20 = arith.constant 0 : index
    %c0_21 = arith.constant 0 : index
    %23 = memref.load %arg9[%c0_20, %c0_21] : memref<1x1xf32, #tpu.memory_space<smem>>
    %24 = vector.broadcast %23 : f32 to vector<1x8xf32>
    %25 = arith.addf %22, %24 : vector<1x8xf32>
    %c0_22 = arith.constant 0 : index
    %c0_23 = arith.constant 0 : index
    %26 = vector.load %arg10[%c0_22, %c0_23] : memref<1x8xf32, #tpu.memory_space<vmem>>, vector<1x8xf32>
    tpu.vector_store %arg10[%c0_22, %c0_23], %25 {strides = array<i32>} : memref<1x8xf32, #tpu.memory_space<vmem>>, vector<1x8xf32>,
    return
  }
  func.func @transform_0(%arg0: i32) -> (i32, i32) {
    %c0_i32 = arith.constant 0 : i32
    %c0_i32_0 = arith.constant 0 : i32
    return %c0_i32, %arg0 : i32, i32
  }
  func.func @transform_1(%arg0: i32) -> (i32, i32) {
    %c0_i32 = arith.constant 0 : i32
    %c0_i32_0 = arith.constant 0 : i32
    return %c0_i32, %arg0 : i32, i32
  }
  func.func @transform_2(%arg0: i32) -> (i32, i32) {
    %c0_i32 = arith.constant 0 : i32
    %c0_i32_0 = arith.constant 0 : i32
    %c0_i32_1 = arith.constant 0 : i32
    return %c0_i32, %c0_i32_0 : i32, i32
  }
  func.func @transform_3(%arg0: i32) -> (i32, i32) {
    %c0_i32 = arith.constant 0 : i32
    %c0_i32_0 = arith.constant 0 : i32
    %c0_i32_1 = arith.constant 0 : i32
    return %c0_i32, %c0_i32_0 : i32, i32
  }
  func.func @transform_4(%arg0: i32) -> (i32, i32) {
    %c0_i32 = arith.constant 0 : i32
    %c0_i32_0 = arith.constant 0 : i32
    %c0_i32_1 = arith.constant 0 : i32
    return %c0_i32, %c0_i32_0 : i32, i32
  }
  func.func @transform_5(%arg0: i32) -> (i32, i32) {
    %c0_i32 = arith.constant 0 : i32
    %c0_i32_0 = arith.constant 0 : i32
    %c0_i32_1 = arith.constant 0 : i32
    return %c0_i32, %c0_i32_0 : i32, i32
  }
  func.func @transform_6(%arg0: i32) -> (i32, i32) {
    %c0_i32 = arith.constant 0 : i32
    %c0_i32_0 = arith.constant 0 : i32
    %c0_i32_1 = arith.constant 0 : i32
    return %c0_i32, %c0_i32_0 : i32, i32
  }
  func.func @transform_7(%arg0: i32) -> (i32, i32) {
    %c0_i32 = arith.constant 0 : i32
    %c0_i32_0 = arith.constant 0 : i32
    %c0_i32_1 = arith.constant 0 : i32
    return %c0_i32, %c0_i32_0 : i32, i32
  }
  func.func @transform_8(%arg0: i32) -> (i32, i32) {
    %c0_i32 = arith.constant 0 : i32
    %c0_i32_0 = arith.constant 0 : i32
    %c0_i32_1 = arith.constant 0 : i32
    return %c0_i32, %c0_i32_0 : i32, i32
  }
  func.func @transform_9(%arg0: i32) -> (i32, i32) {
    %c0_i32 = arith.constant 0 : i32
    %c0_i32_0 = arith.constant 0 : i32
    return %c0_i32, %arg0 : i32, i32
  }
}

</mosaic_0001>

<bundles_post_ra>
// kernel: tpu_custom_call.1
= control target key start
LH: loop header
LB: loop body
LE: loop exit
PB: predicated region body
PF: predicated region fallthrough
CT: control target
= control target key end

     0   :  { %vm63_vm0 = vcmask 1041408   ;;  %vm56_vm1 = vcmask 31744   ;;  %vm138_vm2 = vcmask 1045504   ;;  %vm131_vm3 = vcmask 97280   ;;  %s610_s0 = inlined_call_operand.vmem [shape: bf16[12,8], index: 0, kind: input, shape index: {}]   ;;  %s611_s1 = inlined_call_operand.vmem [shape: bf16[4,8], index: 1, kind: input, shape index: {}]   ;;  %s612_s2 = inlined_call_operand.vmem [shape: bf16[32,12], index: 2, kind: input, shape index: {}]   ;;  %s613_s3 = inlined_call_operand.vmem [shape: bf16[32,4], index: 3, kind: input, shape index: {}]   ;;  %s614_s4 = inlined_call_operand.vmem [shape: f32[32,1], index: 4, kind: input, shape index: {}]   ;;  %s615_s5 = inlined_call_operand.vmem [shape: bf16[32,32], index: 5, kind: input, shape index: {}]   ;;  %s616_s6 = inlined_call_operand.vmem [shape: f32[32,1], index: 6, kind: input, shape index: {}]   ;;  %s617_s7 = inlined_call_operand.vmem [shape: bf16[1,32], index: 7, kind: input, shape index: {}]   ;;  %s618_s8 = inlined_call_operand.<no memory space> [shape: f32[1,1], index: 8, kind: input, shape index: {}]   ;;  %s619_s9 = inlined_call_operand.hbm [shape: f32[1,8], index: 9, kind: output, shape index: {}]  }
   0x1   :  { %v45_v0 = vld [vmem:[%s611_s1] sm:$0x3]  ;;  %v455_v3 = vld [vmem:[%s613_s3 + $0x8] sm:$0xff]   ;;  %v193_v8 = vld [vmem:[%s614_s4 + $0x10] sm:$0xff]  ;;  %v485_v9 = vmov 0  }
   0x2   :  { %v454_v1 = vld [vmem:[%s613_s3] sm:$0xff]   ;;  %446 = vmatprep.subr.msk.bf16.mxu0 %vm63_vm0, %v45_v0  ;;  %v65_v2 = vsel %vm63_vm0, %v45_v0, 0  ;;  %452 = vset.pattern.permute.xlu0 %v485_v9  ;;  %v192_v10 = vld [vmem:[%s614_s4 + $0x8] sm:$0xff]  ;;  %v194_v11 = vld [vmem:[%s614_s4 + $0x18] sm:$0xff] }
   0x3   :  { %415 = vmatpush3.bf16.msra.mxu0 %v65_v2  ;;  %416 = vmatprep.mubr.msk.bf16.mxu0 %vm56_vm1, %v454_v1  ;;  %v456_v4 = vld [vmem:[%s610_s0] sm:$0x3f]  }
   0x4   :  { %v457_v5 = vld [vmem:[%s612_s2] sm:$0xff]   ;;  %447 = vmatprep.subr.msk.bf16.mxu0 %vm138_vm2, %v456_v4  ;;  %v140_v6 = vsel %vm138_vm2, %v456_v4, 0  ;;  %453 = vset.pattern.permute.xlu1 %v485_v9 }
   0x5   :  { %v191_v7 = vld [vmem:[%s614_s4] sm:$0xff]  ;;  %207 = vperm.xlu1 %453, %v193_v8  }
   0x6   :  { %417 = vmatmul.mubr.msk.bf16.vlgmr.msra.gmra.mrb[0].mxu0 %vm56_vm1, %v455_v3  ;;  %197 = vperm.xlu0 %452, %v191_v7  }
   0x7   :  { %421 = vmatpush3.bf16.msra.mxu0 %v140_v6  ;;  %422 = vmatprep.mubr.msk.bf16.mxu0 %vm131_vm3, %v457_v5 }
   0x8   :  { %15 = vsyncpa [#allocation4], 0  ;;  %v458_v12 = vld [vmem:[%s612_s2 + $0x8] sm:$0xff]   ;;  %v229_v13 = vld [vmem:[%s616_s6] sm:$0xff]  ;;  %vm263_vm4 = vcmask 261120   ;;  %v486_v37 = vmov 0.0   ;;  %v327_v57 = vstv %s618_s8 }
   0x9   :  { %212 = vperm.xlu1 %453, %v194_v11   ;;  %v230_v14 = vld [vmem:[%s616_s6 + $0x8] sm:$0xff]  ;;  %v231_v15 = vld [vmem:[%s616_s6 + $0x10] sm:$0xff]  ;;  %v232_v16 = vld [vmem:[%s616_s6 + $0x18] sm:$0xff]  ;;  %vm487_vm5 = vmmov 0   ;;  %s488_s1 = smov [#allocation3]   ;;  %vm371_vm6 = vcmask 57344  }
   0xa   :  { %202 = vperm.xlu0 %452, %v192_v10   ;;  %v459_v17 = vld [vmem:[%s615_s5] sm:$0xff]   ;;  %v460_v36 = vld [vmem:[%s615_s5 + $0x8] sm:$0xff]   ;;  %s379_s17 = sshll.u32 %s488_s1, 4  ;;  %s380_s17 = int_to_ptr.vmem [resolvable:$true] %s379_s17 }
   0xb   :  { %430 = vmatprep.mubr.msk.bf16.mxu1 %vm263_vm4, %v459_v17  ;;  %v323_v56 = vld [vmem:[%s617_s7] sm:$0x1]  ;;  %s461_s18 = scalar_lea.vmem %s380_s17, 16  ;;  %s465_s19 = scalar_lea.vmem %s380_s17, 32 }
   0xc   :  { %p462_p0 = scmp.ne.s32.totalorder %s380_s17, %s461_s18  ;;  %p466_p1 = scmp.lt.s32.totalorder %s380_s17, %s380_s17 }
   0xd   :  { %240 = vperm.xlu1 %453, %v230_v14   ;;  %p467_p2 = scmp.lt.s32.totalorder %s465_s19, %s461_s18 }
   0xe   :  { %235 = vperm.xlu0 %452, %v229_v13  }
   0xf   :  { %p468_p3 = por %p467_p2, %p466_p1 }
  0x11   :  { %250 = vperm.xlu1 %453, %v232_v16   ;;  %p469_p4 = pnand %p468_p3, %p462_p0 }
  0x12   :  { %423 = vmatmul.mubr.msk.bf16.vlgmr.msra.gmra.mrb[0].mxu0 %vm131_vm3, %v458_v12  ;;  %245 = vperm.xlu0 %452, %v231_v15  }
  0x84   :  { %v208_v18 = vpop.permute.xlu1 %207 }
  0x85   :  { %v198_v19 = vpop.permute.xlu0 %197 }
  0x88   :  { %v213_v23 = vpop.permute.xlu1 %212 }
  0x89   :  { %v203_v26 = vpop.permute.xlu0 %202 }
  0x8c   :  { %v241_v39 = vpop.permute.xlu1 %240 }
  0x8d   :  { %v236_v38 = vpop.permute.xlu0 %235 }
  0x90   :  { %v251_v44 = vpop.permute.xlu1 %250 }
  0x91   :  { %v246_v40 = vpop.permute.xlu0 %245 }
  0xe5   :  { %v424_v20 = vpop.f32.mrb[0].mxu0 }
  0xe6   :  { %v217_v21 = vadd.f32 %v424_v20, %v208_v18  ;;  %v176_v22 = vpop.f32.mrb[1].mxu0 }
  0xe7   :  { %v215_v24 = vadd.f32 %v198_v19, %v176_v22  ;;  %v425_v25 = vpop.f32.mrb[2].mxu0 }
  0xe8   :  { %v218_v27 = vadd.f32 %v425_v25, %v213_v23  ;;  %v179_v28 = vpop.f32.mrb[3].mxu0  ;;  %v221_v30 = vmax.f32 %v217_v21, 0.0 }
  0xe9   :  { %v216_v29 = vadd.f32 %v203_v26, %v179_v28  ;;  %v219_v32 = vmax.f32 %v215_v24, 0.0 }
  0xea   :  { %v222_v31 = vmax.f32 %v218_v27, 0.0 }
  0xeb   :  { %v220_v33 = vmax.f32 %v216_v29, 0.0 }
  0xec   :  { %v228_v34 = vpack.c.bf16 %v222_v31, %v221_v30 }
  0xed   :  { %v227_v35 = vpack.c.bf16 %v220_v33, %v219_v32 }
  0xef   :  { %426 = vmatprep.subr.bf16.mxu1 %v227_v35 }
  0xf0   :  { %427 = vmatpush3.bf16.msra.mxu1 %v227_v35 }
  0xf1   :  { %428 = vmatprep.subr.bf16.mxu1 %v228_v34 }
  0xf4   :  { %429 = vmatpush3.bf16.msra.mxu1 %v228_v34 }
  0xf5   :  { %434 = vmatprep.subr.bf16.mxu1 %v486_v37 }
  0xf7   :  { %431 = vmatmul.mubr.msk.bf16.vlgmr.msra.gmra.mrb[0].mxu1 %vm263_vm4, %v460_v36 }
  0xf8   :  { %438 = vmatprep.mubr.msk.bf16.mxu1 %vm487_vm5, %v486_v37 }
 0x1ca   :  { %v432_v41 = vpop.f32.mrb[0].mxu1 }
 0x1cb   :  { %v313_v42 = vadd.f32 %v432_v41, %v246_v40  ;;  %v304_v43 = vpop.f32.mrb[1].mxu1 }
 0x1cc   :  { %v305_v45 = vadd.f32 %v304_v43, %v236_v38  ;;  %v433_v46 = vpop.f32.mrb[2].mxu1 }
 0x1cd   :  { %v316_v47 = vadd.f32 %v433_v46, %v251_v44  ;;  %v307_v48 = vpop.f32.mrb[3].mxu1  ;;  %v321_v50 = vmax.f32 %v313_v42, 0.0 }
 0x1ce   :  { %v308_v49 = vadd.f32 %v307_v48, %v241_v39  ;;  %v319_v52 = vmax.f32 %v305_v45, 0.0 }
 0x1cf   :  { %v322_v51 = vmax.f32 %v316_v47, 0.0 }
 0x1d0   :  { %v320_v53 = vmax.f32 %v308_v49, 0.0 }
 0x1d1   :  { %v325_v54 = vpack.c.bf16 %v322_v51, %v321_v50 }
 0x1d2   :  { %v324_v55 = vpack.c.bf16 %v320_v53, %v319_v52 }
 0x1d4   :  { %435 = vmatpush3.bf16.msra.mxu1 %v324_v55 }
 0x1d5   :  { %436 = vmatprep.subr.bf16.mxu1 %v486_v37 }
 0x1d8   :  { %437 = vmatpush3.bf16.msra.mxu1 %v325_v54 }
 0x1db   :  { %439 = vmatmul.mubr.msk.bf16.vlgmr.msra.gmra.mrb[4].mxu1 %vm263_vm4, %v323_v56 }
 0x2ae   :  { %v365_v58 = vpop.f32.mrb[4].mxu1 }
 0x2af   :  { %v366_v59 = vadd.f32 %v365_v58, %v327_v57  ;;  %v440_v60 = vpop.f32.mrb[5].mxu1 }
 0x2b0   :  { %v368_v61 = vpop.f32.mrb[6].mxu1 }
 0x2b1   :  { %v441_v62 = vpop.f32.mrb[7].mxu1  ;;  %372 = vst.msk [vmem:[#allocation3] sm:$0x1] %vm371_vm6, %v366_v59 }
 0x2b2   :  { %472 = shalt.err (!%p469_p4)
}
 0x2b3   :  { %s473_s3 = scalar_lea.hbm %s619_s9, 16 }
 0x2b4   :  { %p474_p5 = scmp.ne.s32.totalorder %s619_s9, %s473_s3  ;;  %p477_p6 = scmp.lt.u32.totalorder %s473_s3, %s619_s9 }
 0x2b6   :  { %p479_p7 = pnand %p477_p6, %p474_p5 }
 0x2b8   :  { %482 = shalt.err (!%p479_p7)
}
 0x2b9   :  { %382 = dma.vmem_to_hbm [thread:$0]  %s380_s17, 16, %s619_s9, [#allocation4]  }
 0x2ba   :  { %483 = dma.done.wait [#allocation4], 16  }
 0x2bb   :  { %484 = vsyncadd [#allocation4], 4294967280 }
 0x2bc   :  { %386 = vsyncpa [#allocation4], 1 }

</bundles_post_ra>
